<compile_context>
chip_gen: v6e
topology: v6e:2x2x1
jax: 0.10.0
libtpu: 0.0.40
codegen_flags: <defaults>
</compile_context>

<pallas_src>
import math
import numpy as np
import jax
import jax.numpy as jnp
from jax.experimental import pallas as pl
from jax.experimental.pallas import tpu as pltpu


def _pick_channel_block(C, gc, FT, itemsize, target=32, max_block_bytes=8 << 20):
    """Largest channel block that contains whole groups, is 8-aligned,
    divides C, stays near `target` channels, and keeps one (C_blk, FT)
    buffer under max_block_bytes."""
    base = (8 * gc) // math.gcd(8, gc)            # lcm(8, gc)
    if C % base != 0:
        return C                                  # fall back: full-channel block
    cands = [m for m in range(base, C + 1, base) if C % m == 0]
    fitting = [m for m in cands if m * FT * itemsize <= max_block_bytes]
    pool = fitting if fitting else [cands[0]]
    under = [m for m in pool if m <= target]
    return max(under) if under else min(pool)


def _make_bfgn_kernel(gc, FT, eps):
    n = float(gc * FT)                            # elements per GroupNorm group
    inv_n = 1.0 / n
    inv_nm1 = 1.0 / max(n - 1.0, 1.0)             # torch .std() default -> unbiased

    def kernel(x_ref, gmat_ref, gamma_ref, out_ref):
        x = x_ref[0]                              # (C_blk, FT), native dtype, lane-dense
        xf = x.astype(jnp.float32)                # f32 working copy (stats + scale)

        # Per-channel lane reductions, accumulated in f32.
        s1 = jnp.sum(xf, axis=1, keepdims=True)           # (C_blk, 1)  sum x
        s2 = jnp.sum(xf * xf, axis=1, keepdims=True)      # (C_blk, 1)  sum x^2

        # Pool within each group and broadcast back to every channel with ONE
        # tiny matmul against the block-diagonal 0/1 indicator (fused s1|s2).
        s12 = jnp.concatenate([s1, s2], axis=1)            # (C_blk, 2)
        g12 = jnp.dot(gmat_ref[...], s12,
                      preferred_element_type=jnp.float32)  # (C_blk, 2)
        g1 = g12[:, 0:1]
        g2 = g12[:, 1:2]

        mean = g1 * inv_n
        var = (g2 - n * mean * mean) * inv_nm1
        var = jnp.maximum(var, 0.0)               # cancellation guard (no NaN sqrt)
        std = jnp.sqrt(var)

        # Fused per-channel scale: gamma / (std + eps) -- touches only C_blk
        # elements, so the exact divide is free next to the (C_blk, FT) tile.
        scale = gamma_ref[...] / (std + eps)      # (C_blk, 1)

        out_ref[0] = (xf * scale).astype(out_ref.dtype)    # single full-tile multiply

    return kernel


def bias_free_group_norm_pallas(x_nchw, gamma, *, num_groups=32, eps=1e-7):
    B, C, Fd, Td = x_nchw.shape
    assert C % num_groups == 0
    gc = C // num_groups
    FT = Fd * Td
    dtype = x_nchw.dtype
    itemsize = jnp.dtype(dtype).itemsize

    # NCHW is already (C, F*T)-contiguous per batch -> pure reshape, no transpose,
    # and NO dtype cast (native-dtype I/O keeps the kernel on the HBM roofline).
    x_flat = x_nchw.reshape(B, C, FT)

    C_blk = _pick_channel_block(C, gc, FT, itemsize)
    n_cblk = C // C_blk

    # Block-local same-group indicator: identical for every channel block since
    # groups never straddle a block (C_blk is a multiple of gc).
    local_grp = np.arange(C_blk) // gc
    gmat = jnp.asarray((local_grp[:, None] == local_grp[None, :]).astype(np.float32))
    gamma_col = jnp.asarray(gamma, jnp.float32).reshape(C, 1)

    kernel = _make_bfgn_kernel(gc, FT, eps)

    # VMEM budget: in + out blocks double-buffered (native dtype) plus the f32
    # working copy and a little slack.  Explicit limit so v5e's 16 MiB default
    # scoped VMEM never re-tiles us, while staying well under v7x's 64 MiB.
    block_bytes = C_blk * FT * itemsize
    vmem_needed = 4 * block_bytes + 2 * C_blk * FT * 4 + (1 << 20)
    vmem_limit = int(min(100 << 20, max(vmem_needed, 16 << 20)))

    cost = pl.CostEstimate(
        flops=3 * B * C * FT + B * n_cblk * 2 * 2 * C_blk * C_blk,
        transcendentals=0,
        bytes_accessed=2 * B * C * FT * itemsize + int(gmat.size) * 4 + C * 4,
    )

    # TODO(synk): for F*T so large that a single (C_blk, FT) block cannot fit
    # VMEM even at C_blk = gc, a two-pass (carried-stats) split over FT would
    # be needed; typical UNet feature maps do not hit that.
    out_flat = pl.pallas_call(
        kernel,
        out_shape=jax.ShapeDtypeStruct((B, C, FT), dtype),
        grid=(B, n_cblk),
        in_specs=[
            pl.BlockSpec((1, C_blk, FT), lambda b, c: (b, c, 0)),   # x block
            pl.BlockSpec((C_blk, C_blk), lambda b, c: (0, 0)),      # group indicator (shared)
            pl.BlockSpec((C_blk, 1), lambda b, c: (c, 0)),          # gamma column block
        ],
        out_specs=pl.BlockSpec((1, C_blk, FT), lambda b, c: (b, c, 0)),
        compiler_params=pltpu.CompilerParams(
            dimension_semantics=("parallel", "parallel"),
            vmem_limit_bytes=vmem_limit,
        ),
        cost_estimate=cost,
    )(x_flat, gmat, gamma_col)

    return out_flat.reshape(B, C, Fd, Td)


def bias_free_group_norm_reference(x_nchw, gamma, *, num_groups=32, eps=1e-7):
    """Plain-JAX (f32) reference matching the PyTorch module exactly."""
    B, C, Fd, Td = x_nchw.shape
    gc = C // num_groups
    xf = x_nchw.astype(jnp.float32)
    xg = xf.reshape(B, num_groups, gc * Fd * Td)
    std = jnp.std(xg, axis=-1, keepdims=True, ddof=1)     # torch .std() -> unbiased
    xn = (xg / (std + eps)).reshape(B, C, Fd, Td)
    return xn * jnp.asarray(gamma, jnp.float32).reshape(1, C, 1, 1)


if __name__ == "__main__":
    # Small but representative shapes consistent with the module defaults:
    # num_groups=32 -> C multiple of 32; (F, T) = (16, 16) so F*T = 256 is
    # lane-dense (multiple of 128).
    B, C, Fd, Td = 2, 64, 16, 16
    num_groups, eps = 32, 1e-7

    key = jax.random.PRNGKey(0)
    kx, kg = jax.random.split(key, 2)

    x_f32 = jax.random.normal(kx, (B, C, Fd, Td), dtype=jnp.float32)
    # Module initializes gamma to ones; use non-trivial values to actually
    # exercise the scale path (forward semantics are identical).
    gamma = (1.0 + 0.1 * jax.random.normal(kg, (1, C, 1, 1))).astype(jnp.float32)

    # f32 input: tight check against the reference.
    out_f32 = jax.block_until_ready(
        bias_free_group_norm_pallas(x_f32, gamma, num_groups=num_groups, eps=eps))
    ref_f32 = jax.block_until_ready(
        bias_free_group_norm_reference(x_f32, gamma, num_groups=num_groups, eps=eps))
    assert out_f32.shape == (B, C, Fd, Td) and out_f32.dtype == jnp.float32
    err_f32 = float(jnp.max(jnp.abs(out_f32 - ref_f32)))
    if not np.isfinite(err_f32) or err_f32 > 1e-3:
        raise AssertionError(f"f32 mismatch vs reference: max abs err = {err_f32}")

    # bf16 input: native-dtype I/O path (stats still accumulated in f32).
    x_bf16 = x_f32.astype(jnp.bfloat16)
    out_bf16 = jax.block_until_ready(
        bias_free_group_norm_pallas(x_bf16, gamma, num_groups=num_groups, eps=eps))
    ref_bf16 = jax.block_until_ready(
        bias_free_group_norm_reference(x_bf16, gamma, num_groups=num_groups, eps=eps))
    assert out_bf16.dtype == jnp.bfloat16
    err_bf16 = float(jnp.max(jnp.abs(out_bf16.astype(jnp.float32) - ref_bf16)))
    if not np.isfinite(err_bf16) or err_bf16 > 5e-2:
        raise AssertionError(f"bf16 mismatch vs reference: max abs err = {err_bf16}")

    print("KERNEL_OK")
</pallas_src>

<mosaic_0001>
module attributes {stable_mosaic.version = 11 : i64} {
  func.func @kernel(%arg0: i32, %arg1: i32, %arg2: memref<1x32x256xf32, #tpu.memory_space<vmem>>, %arg3: memref<32x32xf32, #tpu.memory_space<vmem>>, %arg4: memref<32x1xf32, #tpu.memory_space<vmem>>, %arg5: memref<1x32x256xf32, #tpu.memory_space<vmem>>) attributes {dimension_semantics = [#tpu.dimension_semantics<parallel>, #tpu.dimension_semantics<parallel>], iteration_bounds = array<i64: 2, 2>, scalar_prefetch = 0 : i64, scratch_operands = 0 : i64, tpu.core_type = #tpu.core_type<tc>, window_params = [{transform_indices = @transform_0, window_bounds = array<i64: 1, 32, 256>}, {pipeline_mode = #tpu.pipeline_mode<synchronous>, transform_indices = @transform_1, window_bounds = array<i64: 32, 32>}, {transform_indices = @transform_2, window_bounds = array<i64: 32, 1>}, {transform_indices = @transform_3, window_bounds = array<i64: 1, 32, 256>}]} {
    %c0 = arith.constant 0 : index
    %c0_0 = arith.constant 0 : index
    %c0_1 = arith.constant 0 : index
    %0 = vector.load %arg2[%c0, %c0_0, %c0_1] : memref<1x32x256xf32, #tpu.memory_space<vmem>>, vector<1x32x256xf32>
    %1 = vector.shape_cast %0 : vector<1x32x256xf32> to vector<32x256xf32>
    %cst = arith.constant dense<0.000000e+00> : vector<32xf32>
    %2 = vector.multi_reduction <add>, %1, %cst [1] : vector<32x256xf32> to vector<32xf32>
    %3 = vector.shape_cast %2 : vector<32xf32> to vector<32x1xf32>
    %4 = arith.mulf %1, %1 : vector<32x256xf32>
    %cst_2 = arith.constant dense<0.000000e+00> : vector<32xf32>
    %5 = vector.multi_reduction <add>, %4, %cst_2 [1] : vector<32x256xf32> to vector<32xf32>
    %6 = vector.shape_cast %5 : vector<32xf32> to vector<32x1xf32>
    %7 = tpu.concatenate %3, %6 in 1 : vector<32x1xf32>, vector<32x1xf32> -> vector<32x2xf32>
    %c0_3 = arith.constant 0 : index
    %c0_4 = arith.constant 0 : index
    %8 = vector.load %arg3[%c0_3, %c0_4] : memref<32x32xf32, #tpu.memory_space<vmem>>, vector<32x32xf32>
    %cst_5 = arith.constant dense<0.000000e+00> : vector<32x2xf32>
    %9 = tpu.matmul %8, %7, %cst_5 {dimension_numbers = #tpu.dot_dimension_numbers<[1], [0], [0], [1], [0, 0, 1, 1], [], []>} : vector<32x32xf32>, vector<32x2xf32>, vector<32x2xf32> -> vector<32x2xf32>
    %10 = vector.extract_strided_slice %9 {offsets = [0, 0], sizes = [32, 1], strides = [1, 1]} : vector<32x2xf32> to vector<32x1xf32>
    %11 = vector.extract_strided_slice %9 {offsets = [0, 1], sizes = [32, 1], strides = [1, 1]} : vector<32x2xf32> to vector<32x1xf32>
    %cst_6 = arith.constant 0.001953125 : f32
    %12 = vector.broadcast %cst_6 : f32 to vector<32x1xf32>
    %13 = arith.mulf %10, %12 : vector<32x1xf32>
    %cst_7 = arith.constant 5.120000e+02 : f32
    %14 = vector.broadcast %cst_7 : f32 to vector<32x1xf32>
    %15 = arith.mulf %14, %13 : vector<32x1xf32>
    %16 = arith.mulf %15, %13 : vector<32x1xf32>
    %17 = arith.subf %11, %16 : vector<32x1xf32>
    %cst_8 = arith.constant 0.00195694715 : f32
    %18 = vector.broadcast %cst_8 : f32 to vector<32x1xf32>
    %19 = arith.mulf %17, %18 : vector<32x1xf32>
    %cst_9 = arith.constant 0.000000e+00 : f32
    %20 = vector.broadcast %cst_9 : f32 to vector<32x1xf32>
    %21 = arith.maximumf %19, %20 : vector<32x1xf32>
    %22 = math.sqrt %21 : vector<32x1xf32>
    %c0_10 = arith.constant 0 : index
    %c0_11 = arith.constant 0 : index
    %23 = vector.load %arg4[%c0_10, %c0_11] : memref<32x1xf32, #tpu.memory_space<vmem>>, vector<32x1xf32>
    %cst_12 = arith.constant 1.000000e-07 : f32
    %24 = vector.broadcast %cst_12 : f32 to vector<32x1xf32>
    %25 = arith.addf %22, %24 : vector<32x1xf32>
    %26 = arith.divf %23, %25 : vector<32x1xf32>
    %27 = vector.broadcast %26 : vector<32x1xf32> to vector<32x256xf32>
    %28 = arith.mulf %1, %27 : vector<32x256xf32>
    %c0_13 = arith.constant 0 : index
    %c0_14 = arith.constant 0 : index
    %c0_15 = arith.constant 0 : index
    %29 = vector.load %arg5[%c0_13, %c0_14, %c0_15] : memref<1x32x256xf32, #tpu.memory_space<vmem>>, vector<1x32x256xf32>
    %30 = vector.shape_cast %29 : vector<1x32x256xf32> to vector<32x256xf32>
    %31 = vector.shape_cast %28 : vector<32x256xf32> to vector<1x32x256xf32>
    tpu.vector_store %arg5[%c0_13, %c0_14, %c0_15], %31 {strides = array<i32>} : memref<1x32x256xf32, #tpu.memory_space<vmem>>, vector<1x32x256xf32>,
    return
  }
  func.func @transform_0(%arg0: i32, %arg1: i32) -> (i32, i32, i32) {
    %c0_i32 = arith.constant 0 : i32
    %c0_i32_0 = arith.constant 0 : i32
    return %arg0, %arg1, %c0_i32 : i32, i32, i32
  }
  func.func @transform_1(%arg0: i32, %arg1: i32) -> (i32, i32) {
    %c0_i32 = arith.constant 0 : i32
    %c0_i32_0 = arith.constant 0 : i32
    %c0_i32_1 = arith.constant 0 : i32
    return %c0_i32, %c0_i32_0 : i32, i32
  }
  func.func @transform_2(%arg0: i32, %arg1: i32) -> (i32, i32) {
    %c0_i32 = arith.constant 0 : i32
    %c0_i32_0 = arith.constant 0 : i32
    return %arg1, %c0_i32 : i32, i32
  }
  func.func @transform_3(%arg0: i32, %arg1: i32) -> (i32, i32, i32) {
    %c0_i32 = arith.constant 0 : i32
    %c0_i32_0 = arith.constant 0 : i32
    return %arg0, %arg1, %c0_i32 : i32, i32, i32
  }
}

</mosaic_0001>

<bundles_post_ra>
// kernel: tpu_custom_call.1
= control target key start
LH: loop header
LB: loop body
LE: loop exit
PB: predicated region body
PF: predicated region fallthrough
CT: control target
= control target key end

     0   :  { %8 = vsyncpa [#allocation3], 0  ;;  %s1191_s0 = inlined_call_operand.hbm [shape: f32[2,64,256], index: 0, kind: input, shape index: {}]   ;;  %s1192_s1 = inlined_call_operand.vmem [shape: f32[32,32], index: 1, kind: input, shape index: {}]   ;;  %s1193_s2 = inlined_call_operand.vmem [shape: f32[64,1], index: 2, kind: input, shape index: {}]   ;;  %s1194_s3 = inlined_call_operand.hbm [shape: f32[2,64,256], index: 3, kind: output, shape index: {}]  }
   0x1   :  { %10 = vsyncpa [#allocation3 + $0x1], 0 }
   0x2   :  { %11 = vsyncpa [#allocation4], 0 }
   0x3   :  { %13 = vsyncpa [#allocation4 + $0x1], 0  ;;  %s949_s12 = smov 0   ;;  %s951_s13 = smov 0  }
   0x4   :  { %s953_s14 = smov 0   ;;  %s955_s15 = smov 0  }
   0x5   :  { %s957_s16 = smov 0   ;;  %s959_s17 = smov 0  }
   0x6   :  { %s961_s18 = smov 0   ;;  %s963_s19 = smov 0  }
   0x7 LB: > { %s634_s20 = sadd.s32 4294967295, %s918_s19   ;;  %s635_s21 = sadd.s32 4294967294, %s918_s19   ;;  %s918_s19 = sphi %s963_s19, %s19_s19   ;;  %s914_s18 = sphi %s961_s18, %s1212_s18   ;;  %s910_s17 = sphi %s959_s17, %s1211_s17   ;;  %s906_s16 = sphi %s957_s16, %s1210_s16   ;;  %s902_s15 = sphi %s955_s15, %s1209_s15   ;;  %s898_s14 = sphi %s953_s14, %s1208_s14   ;;  %s894_s13 = sphi %s951_s13, %s1207_s13   ;;  %s890_s12 = sphi %s949_s12, %s1206_s12  }
   0x8   : > { %s28_s22 = sadd.s32 1, %s910_s17  ;;  %s31_s23 = sadd.s32 1, %s914_s18 }
   0x9   : > { %p29_p0 = scmp.ge.s32.totalorder %s28_s22, 2  ;;  %s40_s24 = sadd.s32 1, %s898_s14 }
   0xa   : > { %p47_p1 = scmp.ne.s32.totalorder %s898_s14, %s894_s13  ;;  %p48_p2 = scmp.eq.s32.totalorder %s918_s19, 0 }
   0xb   : > { %s1214_s22 = smov (%p29_p0, %s28_s22), 0  ;;  %s1216_s23 = smov (!%p29_p0, %s31_s23), %s914_s18 }
   0xc   : > { %1197 = sst [smem:[#allocation8_spill]] %s1214_s22  ;;  %s36_s25 = ssub.s32 %s910_s17, %s1214_s22 }
   0xd   : > { %p1002_p3 = por %p48_p2, %p47_p1  ;;  %p33_p4 = scmp.ge.s32.totalorder %s1216_s23, 2 }
   0xe   : > { %p53_p5 = scmp.ne.s32.totalorder %s894_s13, %s890_s12  ;;  %p54_p6 = scmp.eq.s32.totalorder %s634_s20, 0 }
   0xf   : > { %p126_p7 = scmp.eq.s32.totalorder %s634_s20, 3  ;;  %s1218_s23 = smov (%p33_p4, %s1216_s23), 0 }
  0x10   : > { %1199 = sst [smem:[#allocation9_spill]] %s1218_s23  ;;  %p1010_p8 = por %p54_p6, %p53_p5 }
  0x11   : > { %p1014_p9 = por %p126_p7, %p47_p1  ;;  %s35_s29 = ssub.s32 %s914_s18, %s1218_s23 }
  0x12   : > { %p132_p10 = scmp.eq.s32.totalorder %s635_s21, 3  ;;  %s37_s30 = sor.u32 %s36_s25, %s35_s29 }
  0x13   : > { %p38_p11 = scmp.eq.s32.totalorder %s37_s30, 0  ;;  %p703_p13 = scmp.lt.s32.totalorder %s918_s19, 4 }
  0x14   : > { %p1020_p12 = por %p132_p10, %p53_p5  ;;  %s155_s5 = sand.u32 1, %s898_s14  }
  0x15   : > { %s1027_s6 = scalar_select %p38_p11, %s898_s14, %s40_s24  }
  0x16   : > { %s638_s7 = sshll.u32 %s155_s5, 6  ;;  %s659_s8 = sshll.u32 %s910_s17, 3 }
  0x17   : > { %s641_s9 = sshll.u32 %s914_s18, 4  ;;  %s159_s10 = scalar_lea.vmem [#allocation2], %s638_s7 }
  0x18   : > { %s169_s11 = sshll.u32 %s159_s10, 4  ;;  %s166_s20 = sadd.s32 %s659_s8, %s641_s9  ;;  %s170_s11 = int_to_ptr.vmem [resolvable:$true] %s169_s11 }
  0x19   : > { %s642_s23 = sshll.u32 %s166_s20, 7  ;;  %p1033_p0 = pnand %p703_p13, %p1002_p3 }
  0x1a   : > { %s168_s30 = scalar_lea.hbm %s1191_s0, %s642_s23  ;;  %s156_s24 = scalar_lea.sflag [#allocation3], %s155_s5 }
  0x1b   : > { %p796_p1 = pneg %p1033_p0  ;;  %s807_s22 = scalar_lea.vmem %s170_s11, 1024 }
  0x1c   : > { %p808_p2 = scmp.ne.s32.totalorder %s170_s11, %s807_s22  ;;  %s920_s7 = smov [#allocation2]  }
  0x1d   : > { %s812_s8 = sshll.u32 %s920_s7, 4  ;;  %s813_s8 = int_to_ptr.vmem [resolvable:$false] %s812_s8 }
  0x1e   : > { %p810_p4 = pnand %p808_p2, %p796_p1  ;;  %s814_s26 = scalar_lea.vmem %s813_s8, 2048 }
  0x1f   : > { %p815_p3 = scmp.lt.s32.totalorder %s170_s11, %s813_s8  ;;  %p816_p6 = scmp.lt.s32.totalorder %s814_s26, %s807_s22 }
  0x20   : > { %p811_p5 = pneg %p810_p4 }
  0x21   : > { %p817_p7 = por %p816_p6, %p815_p3 }
  0x23   : > { %p818_p10 = pnand %p817_p7, %p811_p5 }
  0x25   : > { %821 = shalt.err (!%p818_p10)
}
  0x26   : > { %s921_s9 = smov 256   ;;  %s922_s23 = smov 16  }
  0x27   : > { %698 = dma.hbm_to_vmem [thread:$0]  (!%p1033_p0), %s168_s30, 1024, %s170_s11, %s156_s24, %s921_s9, %s921_s9, %s922_s23  }
  0x28   : > { %p643_p11 = scmp.ge.s32.totalorder %s918_s19, 1  ;;  %p186_p13 = scmp.lt.s32.totalorder %s918_s19, 5 }
  0x2a   : > { %p187_p1 = pnand %p643_p11, %p186_p13 }
  0x2b   : > { %s1047_s5 = sand.u32 (!%p187_p1), 1, %s894_s13  }
  0x2c   : > { %190 = sbr.rel (%p187_p1) target bundleno = 826 (0x33a), region = 32  ;;  %s644_s22 = sshll.u32 (!%p187_p1), %s1047_s5, 6 }
  0x2d   : > { %s193_s10 = scalar_lea.sflag (!%p187_p1), [#allocation3], %s1047_s5  ;;  %s196_s20 = scalar_lea.vmem (!%p187_p1), [#allocation2], %s644_s22 }
  0x31   : > { %881 = dma.done.wait (%p1010_p8), %s193_s10, 1024  }
  0x32   : > { %883 = vsyncadd (%p1010_p8), %s193_s10, 4294966272  ;;  %v1057_v0 = vld [vmem:[%s196_s20 + $0x30] sm:$0xff]  ;;  %v1059_v1 = vld [vmem:[%s196_s20 + $0x38] sm:$0xff]  ;;  %vm281_vm0 = vcmask 261120   ;;  %vm272_vm1 = vcmask 7168   ;;  %s923_s8 = smov 1  }
  0x33   : > { %v1061_v2 = vld [vmem:[%s196_s20 + $0x20] sm:$0xff]  ;;  %v249_v3 = vadd.f32 %v1059_v1, %v1057_v0  ;;  %v1065_v4 = vld [vmem:[%s196_s20 + $0x28] sm:$0xff]  ;;  %v258_v5 = vmul.f32 %v1057_v0, %v1057_v0  ;;  %v259_v6 = vmul.f32 %v1059_v1, %v1059_v1  ;;  %v1073_v8 = vld [vmem:[%s196_s20 + $0x10] sm:$0xff]  ;;  %s925_s26 = smov 127   ;;  %s646_s9 = sshll.u32 %s902_s15, 2 }
  0x34   : > { %v256_v7 = vmul.f32 %v1061_v2, %v1061_v2  ;;  %v1075_v9 = vld [vmem:[%s196_s20 + $0x18] sm:$0xff]  ;;  %v246_v10 = vadd.f32 %v1065_v4, %v1061_v2  ;;  %v257_v11 = vmul.f32 %v1065_v4, %v1065_v4  ;;  %v254_v14 = vmul.f32 %v1073_v8, %v1073_v8  ;;  %v1085_v16 = vld [vmem:[%s196_s20] sm:$0xff]  ;;  %v1087_v17 = vld [vmem:[%s196_s20 + $0x8] sm:$0xff]  ;;  %p226_p8 = scmp.lt.s32.totalorder %s646_s9, 7  ;;  %s660_s11 = sshll.u32 %s902_s15, 3 }
  0x35   : > { %250 = vadd.xlane.f32.xlu0 %v249_v3  ;;  %v269_v12 = vadd.f32 %v259_v6, %v258_v5  ;;  %v255_v15 = vmul.f32 %v1075_v9, %v1075_v9  ;;  %v243_v18 = vadd.f32 %v1075_v9, %v1073_v8  ;;  %v252_v20 = vmul.f32 %v1085_v16, %v1085_v16  ;;  %v277_v24 = vld [vmem:[%s1192_s1] sm:$0xff]  ;;  %v279_v25 = vld [vmem:[%s1192_s1 + $0x10] sm:$0xff]  ;;  %v278_v38 = vld [vmem:[%s1192_s1 + $0x8] sm:$0xff]  ;;  %s655_s21 = sshll.u32 %s906_s16, 4  ;;  %s223_s29 = scalar_lea.vmem [#allocation5], %s644_s22 }
  0x36   : > { %247 = vadd.xlane.f32.xlu1 %v246_v10  ;;  %v266_v13 = vadd.f32 %v257_v11, %v256_v7  ;;  %v253_v21 = vmul.f32 %v1087_v17, %v1087_v17  ;;  %v240_v22 = vadd.f32 %v1087_v17, %v1085_v16  ;;  %677 = vmatprep.mubr.msk.f32.mxu0 %vm281_vm0, %v277_v24  ;;  %v280_v39 = vld [vmem:[%s1192_s1 + $0x18] sm:$0xff]  ;;  %s1220_s9 = smov (!%p226_p8, %s646_s9), 7  ;;  %s529_s25 = sadd.s32 %s660_s11, %s655_s21 }
  0x37   : > { %v263_v19 = vadd.f32 %v255_v15, %v254_v14  ;;  %680 = vmatprep.mubr.msk.f32.mxu1 %vm281_vm0, %v279_v25  ;;  %s647_s23 = sshll.u32 %s1220_s9, 3  ;;  %s532_s30 = sshll.u32 %s223_s29, 4  ;;  %s1129_s30 = int_to_ptr.vmem [resolvable:$true] %s532_s30 }
  0x38   : > { %v260_v23 = vadd.f32 %v253_v21, %v252_v20  ;;  %s229_s27 = scalar_lea.vmem %s1193_s2, %s647_s23  ;;  %s656_s15 = sshll.u32 %s529_s25, 7 }
  0x39   : > { %270 = vadd.xlane.f32.xlu0 %v269_v12  ;;  %s1136_s24 = scalar_lea.hbm %s1194_s3, %s656_s15  ;;  %s516_s7 = scalar_lea.sflag [#allocation4], %s1047_s5 }
  0x3a   : > { %267 = vadd.xlane.f32.xlu1 %v266_v13 }
  0x3d   : > { %244 = vadd.xlane.f32.xlu0 %v243_v18 }
  0x3e   : > { %264 = vadd.xlane.f32.xlu1 %v263_v19 }
  0x41   : > { %241 = vadd.xlane.f32.xlu0 %v240_v22  ;;  %v924_v22 = vmov 0  }
  0x42   : > { %261 = vadd.xlane.f32.xlu1 %v260_v23  ;;  %777 = vset.pattern.permute.xlu0 %v924_v22 }
  0x43   : > { %776 = vset.pattern.permute.xlu1 %v924_v22 }
  0xbe   : > { %v251_v26 = vpop.xlane.xlu0 %250 }
  0xbf   : > { %v248_v27 = vpop.xlane.xlu1 %247 }
  0xc2   : > { %v271_v28 = vpop.xlane.xlu0 %270 }
  0xc3   : > { %v276_v29 = vsel %vm272_vm1, %v251_v26, %v271_v28  ;;  %v268_v30 = vpop.xlane.xlu1 %267 }
  0xc4   : > { %669 = vmatprep.subr.mxu0 %v276_v29  ;;  %683 = vmatprep.subr.mxu1 %v276_v29  ;;  %v275_v31 = vsel %vm272_vm1, %v248_v27, %v268_v30 }
  0xc5   : > { %670 = vmatpush3.msra.mxu0 %v276_v29  ;;  %687 = vmatpush3.msra.mxu1 %v276_v29 }
  0xc6   : > { %671 = vmatprep.subr.mxu0 %v275_v31  ;;  %684 = vmatprep.subr.mxu1 %v275_v31  ;;  %v245_v32 = vpop.xlane.xlu0 %244 }
  0xc7   : > { %v265_v33 = vpop.xlane.xlu1 %264  ;;  %672 = vmatpush3.msra.mxu0 %v275_v31  ;;  %688 = vmatpush3.msra.mxu1 %v275_v31 }
  0xc8   : > { %v274_v34 = vsel %vm272_vm1, %v245_v32, %v265_v33 }
  0xc9   : > { %673 = vmatprep.subr.mxu0 %v274_v34  ;;  %685 = vmatprep.subr.mxu1 %v274_v34 }
  0xca   : > { %674 = vmatpush3.msra.mxu0 %v274_v34  ;;  %689 = vmatpush3.msra.mxu1 %v274_v34  ;;  %v242_v35 = vpop.xlane.xlu0 %241 }
  0xcb   : > { %v262_v36 = vpop.xlane.xlu1 %261 }
  0xcc   : > { %v273_v37 = vsel %vm272_vm1, %v242_v35, %v262_v36 }
  0xcd   : > { %675 = vmatprep.subr.mxu0 %v273_v37  ;;  %686 = vmatprep.subr.mxu1 %v273_v37 }
  0xce   : > { %676 = vmatpush3.msra.mxu0 %v273_v37  ;;  %690 = vmatpush3.msra.mxu1 %v273_v37 }
  0xcf   : > { %678 = vmatmul.mubr.msk.f32.vlgmr.msra.gmra.mxu0 %vm281_vm0, %v278_v38  ;;  %681 = vmatmul.mubr.msk.f32.vlgmr.msra.gmra.mxu1 %vm281_vm0, %v280_v39 }
 0x18f   : > { %v679_v40 = vpop.f32.mrf.mxu0  ;;  %v682_v41 = vpop.f32.mrf.mxu1 }
 0x190   : > { %v380_v42 = vmul.f32 0.001953125, %v679_v40  ;;  %v382_v49 = vmul.f32 0.001953125, %v682_v41 }
 0x191   : > { %v360_v43 = vpop.f32.mrf.mxu0  ;;  %v370_v44 = vpop.f32.mrf.mxu1 }
 0x192   : > { %v384_v45 = vmul.f32 512.0, %v380_v42  ;;  %v379_v46 = vmul.f32 0.001953125, %v360_v43  ;;  %v381_v47 = vmul.f32 0.001953125, %v370_v44  ;;  %v386_v53 = vmul.f32 512.0, %v382_v49 }
 0x194   : > { %v388_v48 = vmul.f32 %v384_v45, %v380_v42  ;;  %v383_v50 = vmul.f32 512.0, %v379_v46  ;;  %v385_v51 = vmul.f32 512.0, %v381_v47  ;;  %v390_v55 = vmul.f32 %v386_v53, %v382_v49  ;;  %v448_v45 = vld [vmem:[%s229_s27 + $0x8] sm:$0xff]  ;;  %v450_v53 = vld [vmem:[%s229_s27 + $0x18] sm:$0xff] }
 0x196   : > { %v387_v52 = vmul.f32 %v383_v50, %v379_v46  ;;  %397 = vrot.lane.b32.xlu1 %v388_v48, %s923_s8  ;;  %v389_v54 = vmul.f32 %v385_v51, %v381_v47  ;;  %v447_v47 = vld [vmem:[%s229_s27] sm:$0xff]  ;;  %v449_v51 = vld [vmem:[%s229_s27 + $0x10] sm:$0xff] }
 0x198   : > { %395 = vrot.lane.b32.xlu0 %v387_v52, %s923_s8 }
 0x19a   : > { %399 = vrot.lane.b32.xlu1 %v389_v54, %s923_s8 }
 0x19e   : > { %401 = vrot.lane.b32.xlu1 %v390_v55, %s923_s8  ;;  %s822_s8 = scalar_lea.vmem %s1129_s30, 1024 }
 0x19f   : > { %p823_p0 = scmp.ne.s32.totalorder %s1129_s30, %s822_s8 }
 0x1a1   : > { %p824_p2 = pnand %p823_p0, %p1014_p9 }
 0x1a3   : > { %p825_p4 = pneg %p824_p2 }
 0x208   : > { %v398_v56 = vpop.permute.xlu1 %397 }
 0x209   : > { %v408_v57 = vsub.f32 %v679_v40, %v398_v56 }
 0x20a   : > { %v396_v58 = vpop.permute.xlu0 %395 }
 0x20b   : > { %v412_v59 = vmul.f32 0.0019569471, %v408_v57  ;;  %v407_v60 = vsub.f32 %v360_v43, %v396_v58 }
 0x20c   : > { %v400_v61 = vpop.permute.xlu1 %399 }
 0x20d   : > { %v416_v62 = vmax.f32 %v412_v59, 0.0  ;;  %v411_v63 = vmul.f32 0.0019569471, %v407_v60  ;;  %v409_v3 = vsub.f32 %v370_v44, %v400_v61 }
 0x20f   : > { %778 = vrsqrt.f32 %v416_v62  ;;  %v415_v5 = vmax.f32 %v411_v63, 0.0  ;;  %v413_v6 = vmul.f32 0.0019569471, %v409_v3  ;;  %vm428_vm2 = vcmp.eq.f32.partialorder %v416_v62, inf }
 0x210   : > { %v402_v7 = vpop.permute.xlu1 %401  ;;  %v431_v19 = vand.u32 2147483648, %v416_v62  ;;  %vm430_vm3 = vcmp.eq.f32.partialorder %v416_v62, 0.0 }
 0x211   : > { %780 = vrsqrt.f32 %v415_v5  ;;  %v417_v10 = vmax.f32 %v413_v6, 0.0  ;;  %v410_v11 = vsub.f32 %v682_v41, %v402_v7  ;;  %vm421_vm4 = vcmp.eq.f32.partialorder %v415_v5, inf }
 0x212   : > { %v424_v25 = vand.u32 2147483648, %v415_v5  ;;  %vm423_vm5 = vcmp.eq.f32.partialorder %v415_v5, 0.0 }
 0x213   : > { %782 = vrsqrt.f32 %v417_v10  ;;  %v414_v12 = vmul.f32 0.0019569471, %v410_v11  ;;  %vm435_vm6 = vcmp.eq.f32.partialorder %v417_v10, inf  ;;  %v438_v30 = vand.u32 2147483648, %v417_v10 }
 0x214   : > { %vm437_vm7 = vcmp.eq.f32.partialorder %v417_v10, 0.0 }
 0x215   : > { %v418_v13 = vmax.f32 %v414_v12, 0.0 }
 0x217   : > { %784 = vrsqrt.f32 %v418_v13  ;;  %vm442_vm8 = vcmp.eq.f32.partialorder %v418_v13, inf  ;;  %v445_v36 = vand.u32 2147483648, %v418_v13  ;;  %vm444_vm9 = vcmp.eq.f32.partialorder %v418_v13, 0.0 }
 0x21c   : > { %v779_v14 = vpop.eup %778 }
 0x21d   : > { %v427_v15 = vmul.f32 %v779_v14, %v416_v62 }
 0x21e   : > { %v781_v18 = vpop.eup %780 }
 0x21f   : > { %v429_v20 = vsel %vm428_vm2, %v416_v62, %v427_v15  ;;  %v420_v21 = vmul.f32 %v781_v18, %v415_v5 }
 0x220   : > { %v783_v23 = vpop.eup %782  ;;  %v432_v24 = vsel %vm430_vm3, %v431_v19, %v429_v20 }
 0x221   : > { %v452_v26 = vadd.f32 1e-07, %v432_v24  ;;  %v422_v27 = vsel %vm421_vm4, %v415_v5, %v420_v21  ;;  %v434_v28 = vmul.f32 %v783_v23, %v417_v10 }
 0x222   : > { %v425_v29 = vsel %vm423_vm5, %v424_v25, %v422_v27 }
 0x223   : > { %461 = vrot.lane.b32.xlu1 %v452_v26, %s925_s26  ;;  %v451_v31 = vadd.f32 1e-07, %v425_v29  ;;  %v436_v32 = vsel %vm435_vm6, %v417_v10, %v434_v28 }
 0x224   : > { %v785_v33 = vpop.eup %784  ;;  %v439_v34 = vsel %vm437_vm7, %v438_v30, %v436_v32 }
 0x225   : > { %459 = vrot.lane.b32.xlu0 %v451_v31, %s925_s26  ;;  %v441_v35 = vmul.f32 %v785_v33, %v418_v13  ;;  %v453_v37 = vadd.f32 1e-07, %v439_v34 }
 0x227   : > { %v443_v38 = vsel %vm442_vm8, %v418_v13, %v441_v35 }
 0x228   : > { %v446_v39 = vsel %vm444_vm9, %v445_v36, %v443_v38 }
 0x229   : > { %463 = vrot.lane.b32.xlu0 %v453_v37, %s925_s26  ;;  %v454_v40 = vadd.f32 1e-07, %v446_v39 }
 0x22b   : > { %465 = vrot.lane.b32.xlu1 %v454_v40, %s925_s26  ;;  %s926_s26 = smov [#allocation5]  }
 0x22c   : > { %s826_s9 = sshll.u32 %s926_s26, 4  ;;  %s827_s9 = int_to_ptr.vmem [resolvable:$false] %s826_s9 }
 0x22d   : > { %s828_s23 = scalar_lea.vmem %s827_s9, 2048  ;;  %p829_p5 = scmp.lt.s32.totalorder %s1129_s30, %s827_s9 }
 0x22e   : > { %p830_p3 = scmp.lt.s32.totalorder %s828_s23, %s822_s8 }
 0x230   : > { %p831_p6 = por %p830_p3, %p829_p5 }
 0x232   : > { %p832_p7 = pnand %p831_p6, %p825_p4 }
 0x295   : > { %v462_v41 = vpop.permute.xlu1 %461 }
 0x296   : > { %786 = vrcp.f32 %v462_v41 }
 0x297   : > { %v460_v42 = vpop.permute.xlu0 %459 }
 0x298   : > { %788 = vrcp.f32 %v460_v42 }
 0x29b   : > { %v464_v43 = vpop.permute.xlu0 %463 }
 0x29c   : > { %790 = vrcp.f32 %v464_v43 }
 0x29d   : > { %v466_v44 = vpop.permute.xlu1 %465 }
 0x29e   : > { %792 = vrcp.f32 %v466_v44 }
 0x2a3   : > { %v787_v46 = vpop.eup %786 }
 0x2a4   : > { %v474_v48 = vmul.f32 %v787_v46, %v448_v45 }
 0x2a5   : > { %v789_v49 = vpop.eup %788 }
 0x2a6   : > { %486 = vperm.xlu1 %776, %v474_v48   ;;  %v472_v50 = vmul.f32 %v789_v49, %v447_v47 }
 0x2a8   : > { %481 = vperm.xlu0 %777, %v472_v50  }
 0x2a9   : > { %v791_v52 = vpop.eup %790 }
 0x2aa   : > { %v476_v54 = vmul.f32 %v791_v52, %v449_v51 }
 0x2ab   : > { %v793_v55 = vpop.eup %792 }
 0x2ac   : > { %491 = vperm.xlu1 %776, %v476_v54   ;;  %v478_v56 = vmul.f32 %v793_v55, %v450_v53 }
 0x2ae   : > { %496 = vperm.xlu0 %777, %v478_v56  }
 0x321   : > { %v487_v57 = vpop.permute.xlu1 %486 }
 0x322   : > { %v501_v58 = vmul.f32 %v487_v57, %v1073_v8  ;;  %v502_v59 = vmul.f32 %v487_v57, %v1075_v9 }
 0x323   : > { %v482_v60 = vpop.permute.xlu0 %481 }
 0x324   : > { %509 = vst [vmem:[%s223_s29 + $0x10] sm:$0xff] %v501_v58  ;;  %510 = vst [vmem:[%s223_s29 + $0x18] sm:$0xff] %v502_v59  ;;  %v499_v61 = vmul.f32 %v482_v60, %v1085_v16  ;;  %v500_v62 = vmul.f32 %v482_v60, %v1087_v17 }
 0x326   : > { %507 = vst [vmem:[%s223_s29] sm:$0xff] %v499_v61  ;;  %508 = vst [vmem:[%s223_s29 + $0x8] sm:$0xff] %v500_v62 }
 0x327   : > { %v492_v63 = vpop.permute.xlu1 %491 }
 0x328   : > { %v503_v8 = vmul.f32 %v492_v63, %v1061_v2  ;;  %v504_v9 = vmul.f32 %v492_v63, %v1065_v4 }
 0x329   : > { %v497_v3 = vpop.permute.xlu0 %496 }
 0x32a   : > { %511 = vst [vmem:[%s223_s29 + $0x20] sm:$0xff] %v503_v8  ;;  %512 = vst [vmem:[%s223_s29 + $0x28] sm:$0xff] %v504_v9  ;;  %v505_v16 = vmul.f32 %v497_v3, %v1057_v0  ;;  %v506_v17 = vmul.f32 %v497_v3, %v1059_v1 }
 0x32c   : > { %513 = vst [vmem:[%s223_s29 + $0x30] sm:$0xff] %v505_v16  ;;  %514 = vst [vmem:[%s223_s29 + $0x38] sm:$0xff] %v506_v17 }
 0x32d   : > { %835 = shalt.err (!%p832_p7)
}
 0x32e   : > { %s836_s10 = scalar_lea.hbm %s1136_s24, 1024  ;;  %s840_s11 = scalar_lea.hbm %s1194_s3, 4096 }
 0x32f   : > { %p837_p10 = scmp.ne.s32.totalorder %s1136_s24, %s836_s10  ;;  %p841_p1 = scmp.lt.s32.totalorder %s1136_s24, %s1194_s3 }
 0x330   : > { %p842_p8 = scmp.lt.s32.totalorder %s840_s11, %s836_s10 }
 0x331   : > { %p838_p11 = pnand %p837_p10, %p1014_p9 }
 0x332   : > { %p843_p0 = por %p842_p8, %p841_p1 }
 0x333   : > { %p839_p13 = pneg %p838_p11 }
 0x335   : > { %p844_p2 = pnand %p843_p0, %p839_p13 }
 0x337   : > { %847 = shalt.err (!%p844_p2)
}
 0x338   : > { %s927_s29 = smov 256   ;;  %s928_s15 = smov 16  }
 0x339   : > { %693 = dma.vmem_to_hbm [thread:$0]  (%p1014_p9), %s1129_s30, 1024, %s1136_s24, %s516_s7, %s927_s29, %s927_s29, %s928_s15  }
 0x33a PF: > { %p704_p4 = scmp.ge.s32.totalorder %s918_s19, 2  ;;  %s547_s16 = sand.u32 1, %s890_s12  }
 0x33b   : > { %s548_s22 = scalar_lea.sflag [#allocation4], %s547_s16 }
 0x33c   : > { %p700_p5 = pnand %p704_p4, %p1020_p12 }
 0x33e   : > { %p701_p3 = pneg %p700_p5 }
 0x340   : > { %885 = dma.done.wait (%p701_p3), %s548_s22, 1024  }
 0x341   : > { %887 = vsyncadd (%p701_p3), %s548_s22, 4294966272  ;;  %s19_s19 = sadd.s32 1, %s918_s19   ;;  %s1204_s28 = sld [smem:[#allocation8_spill]] }
 0x342   : > { %p16_p6 = scmp.ge.s32.totalorder %s19_s19, 6   ;;  %s1205_s5 = sld [smem:[#allocation9_spill]] }
 0x343   : > { %s1206_s12 = smov %s894_s13  ;;  %s1207_s13 = smov %s898_s14 }
 0x344   : > { %s1208_s14 = smov %s1027_s6  ;;  %s1209_s15 = smov %s910_s17 }
 0x345   : > { %s1210_s16 = smov %s914_s18  ;;  %18 = sbr.rel (!%p16_p6) target bundleno = 7 (0x7), region = 80 }
 0x347   : > { %s1211_s17 = smov %s1204_s28 }
 0x348   : > { %s1212_s18 = smov %s1205_s5 }
 0x34a   :  { %553 = vsyncpa [#allocation3], 1 }
 0x34b   :  { %555 = vsyncpa [#allocation3 + $0x1], 1 }
 0x34c   :  { %556 = vsyncpa [#allocation4], 1 }
 0x34d   :  { %558 = vsyncpa [#allocation4 + $0x1], 1 }

</bundles_post_ra>
